<compile_context>
chip_gen: v5e
topology: v5e:2x2
jax: 0.10.0
libtpu: 0.0.40
codegen_flags: <defaults>
</compile_context>

<pallas_src>
import jax
import jax.numpy as jnp
from jax.experimental import pallas as pl
from jax.experimental.pallas import tpu as pltpu


def _glu_kernel(x_ref, w_ref, b_ref, o_ref, acc_ref):
    # x_ref: (tb, tk); w_ref: (tk, 2*od); b_ref: (1, 2*od) f32;
    # o_ref: (tb, od); acc_ref: (tb, 2*od) f32 scratch, resident across k.
    k = pl.program_id(1)

    @pl.when(k == 0)
    def _():
        acc_ref[...] = jnp.zeros_like(acc_ref)

    # One combined matmul with N = 2*out_dim; f32 accumulation on the MXU.
    # Operands are fed in their native dtype (bf16 keeps full MXU throughput).
    acc_ref[...] += jnp.dot(x_ref[...], w_ref[...],
                            preferred_element_type=jnp.float32)

    @pl.when(k == pl.num_programs(1) - 1)
    def _():
        od = o_ref.shape[-1]
        y = acc_ref[...] + b_ref[...]

        # Layer norm over the concatenated feature dim (2*od), no affine,
        # eps=1e-5.  One-pass statistics: both reductions issue as soon as the
        # accumulator is ready (shorter VPU/XLU tail than two-pass).
        inv_n = 1.0 / (2.0 * od)
        mean = jnp.sum(y, axis=-1, keepdims=True) * inv_n
        ex2 = jnp.sum(y * y, axis=-1, keepdims=True) * inv_n
        var = jnp.maximum(ex2 - mean * mean, 0.0)
        inv = jax.lax.rsqrt(var + 1e-5)

        # GLU gate: first half * sigmoid(second half). The split sits on the
        # od-lane boundary (vreg-aligned when od % 128 == 0); the output store
        # is a lane-dense (tb, od) tile.
        ya = (y[:, :od] - mean) * inv
        yg = (y[:, od:] - mean) * inv
        o_ref[...] = (ya * jax.nn.sigmoid(yg)).astype(o_ref.dtype)


def _pick_block_batch(B, itemsize):
    # Target >= 4 grid steps (pipelining + both v7x TensorCores get multiple
    # steps); rows aligned to the dtype's sublane packing (8*f32, 16*bf16);
    # tile capped at 512 rows (per-step amortization saturates around there
    # and smaller tiles keep f32 temporaries within v7x's 64 MiB/TC budget).
    row_align = 8 * max(1, 4 // int(itemsize))
    for tb in (512, 256, 128, 64, 32, 16):
        if tb % row_align:
            continue
        if pl.cdiv(B, tb) >= 4:
            return tb
    # Tiny batch: a single (possibly padded) tile.
    return row_align * pl.cdiv(min(B, 512), row_align)


def _pick_block_k(inp_dim, two_od, w_itemsize, max_resident_bytes=24 << 20):
    # Keep the whole weight resident (single-buffered) when it fits
    # comfortably; otherwise stream K in 128-multiples that divide inp_dim so
    # the resident footprint stays bounded (important on v7x: 64 MiB/TC).
    if inp_dim * two_od * w_itemsize <= max_resident_bytes:
        return inp_dim
    for tk in (2048, 1024, 512, 256, 128):
        if inp_dim % tk == 0:
            return tk
    return inp_dim  # awkward inp_dim: fall back to a fully-resident weight


def glu_forward(x, w, b, *, out_dim, block_batch=None, block_k=None,
                x_buffers=2):
    """TabNet GLU forward: ln(x @ W + b)[:, :od] * sigmoid(ln(...)[:, od:]).

    x: (B, inp_dim); w: (inp_dim, 2*out_dim) (transposed vs. torch Linear
    weight); b: (2*out_dim,). Returns (B, out_dim) in x.dtype.
    x_buffers: depth of the x input pipeline (use 3 on bandwidth-poor v5e).
    """
    B, inp_dim = x.shape
    two_od = 2 * out_dim
    assert w.shape == (inp_dim, two_od)
    assert b.shape == (two_od,)

    tb = _pick_block_batch(B, x.dtype.itemsize) if block_batch is None else block_batch
    tk = _pick_block_k(inp_dim, two_od, w.dtype.itemsize) if block_k is None else block_k
    assert inp_dim % tk == 0, "block_k must divide inp_dim"
    nb = pl.cdiv(B, tb)        # partial last batch tile is masked on store
    nk = inp_dim // tk
    grid = (nb, nk)

    # Full weight passed as-is: no wrapper-side column slicing (which would
    # materialize two fresh HBM copies of W every call). Bias as (1, 2*od) f32.
    b2 = b.astype(jnp.float32).reshape(1, two_od)

    # Grid-invariant operands are single-buffered; the pipeline double-buffers
    # (or deeper, for x) only the operands whose block index actually varies.
    w_bufs = 1 if nk == 1 else 2
    w_pipeline = pl.Buffered(1) if nk == 1 else None
    x_pipeline = pl.Buffered(x_buffers) if x_buffers != 2 else None

    # Explicit VMEM budget for this launch (+ headroom).
    vmem_bytes = (
        w_bufs * tk * two_od * w.dtype.itemsize       # weight buffer(s)
        + x_buffers * tb * tk * x.dtype.itemsize      # x pipeline buffers
        + 2 * tb * out_dim * x.dtype.itemsize         # output double buffer
        + two_od * 4                                  # bias (single buffer)
        + tb * two_od * 4                             # f32 accumulator scratch
        + 6 * tb * two_od * 4                         # f32 LN / gate temporaries
    )
    vmem_limit = min(int(vmem_bytes) + (8 << 20), 128 << 20)

    cost = pl.CostEstimate(
        flops=2 * B * inp_dim * two_od + 8 * B * two_od,
        transcendentals=B * out_dim + B,              # sigmoid + rsqrt
        bytes_accessed=(x.size * x.dtype.itemsize + w.size * w.dtype.itemsize
                        + two_od * 4 + B * out_dim * x.dtype.itemsize),
    )

    return pl.pallas_call(
        _glu_kernel,
        out_shape=jax.ShapeDtypeStruct((B, out_dim), x.dtype),
        grid_spec=pltpu.PrefetchScalarGridSpec(
            num_scalar_prefetch=0,
            grid=grid,
            in_specs=[
                pl.BlockSpec((tb, tk), lambda i, k: (i, k),
                             pipeline_mode=x_pipeline),        # x, pipelined
                pl.BlockSpec((tk, two_od), lambda i, k: (k, 0),
                             pipeline_mode=w_pipeline),        # W
                pl.BlockSpec((1, two_od), lambda i, k: (0, 0),
                             pipeline_mode=pl.Buffered(1)),    # bias, resident
            ],
            out_specs=pl.BlockSpec((tb, out_dim), lambda i, k: (i, 0)),
            scratch_shapes=[pltpu.VMEM((tb, two_od), jnp.float32)],
        ),
        compiler_params=pltpu.CompilerParams(
            dimension_semantics=("parallel", "arbitrary"),
            vmem_limit_bytes=vmem_limit,
        ),
        cost_estimate=cost,
    )(x, w, b2)


def _reference(x, w, b, out_dim):
    y = x.astype(jnp.float32) @ w.astype(jnp.float32) + b.astype(jnp.float32)
    mean = jnp.mean(y, axis=-1, keepdims=True)
    var = jnp.mean((y - mean) ** 2, axis=-1, keepdims=True)
    yn = (y - mean) * jax.lax.rsqrt(var + 1e-5)
    return yn[:, :out_dim] * jax.nn.sigmoid(yn[:, out_dim:])


def _check(out, ref, atol, rtol, name):
    assert out.shape == ref.shape, f"{name}: shape {out.shape} vs {ref.shape}"
    err = jnp.max(jnp.abs(out.astype(jnp.float32) - ref))
    assert jnp.allclose(out.astype(jnp.float32), ref, atol=atol, rtol=rtol), (
        f"{name} mismatch: max abs err = {float(err)}")


if __name__ == "__main__":
    key = jax.random.PRNGKey(0)

    def make_case(seed, batch, inp_dim, out_dim):
        kx, kw, kb = jax.random.split(jax.random.fold_in(key, seed), 3)
        x = jax.random.normal(kx, (batch, inp_dim), dtype=jnp.float32)
        # nn.Linear(inp_dim, 2*out_dim): weight (2*out_dim, inp_dim) -> stored transposed.
        bound = 1.0 / (inp_dim ** 0.5)
        w = jax.random.uniform(kw, (inp_dim, 2 * out_dim), jnp.float32, -bound, bound)
        b = jax.random.uniform(kb, (2 * out_dim,), jnp.float32, -bound, bound)
        return x, w, b

    # Case 1: resident-weight path (nk == 1), batch tiled into 4 steps (tb=64).
    x, w, b = make_case(0, 256, 128, 128)
    ref = _reference(x, w, b, 128)
    out = jax.block_until_ready(glu_forward(x, w, b, out_dim=128))
    _check(out, ref, 5e-4, 5e-4, "f32 resident-weight")

    # Case 2: K-tiled accumulator path (nk == 2) plus a partial last batch
    # tile (B=200, tb=64 -> cdiv grid with a masked 8-row remainder).
    x, w, b = make_case(1, 200, 256, 128)
    ref = _reference(x, w, b, 128)
    out = jax.block_until_ready(glu_forward(x, w, b, out_dim=128, block_k=128))
    _check(out, ref, 5e-4, 5e-4, "f32 k-tiled")

    # Case 3: bf16 operands (full MXU throughput); f32 accumulation in-kernel.
    x, w, b = make_case(2, 256, 128, 128)
    ref = _reference(x, w, b, 128)
    out = jax.block_until_ready(
        glu_forward(x.astype(jnp.bfloat16), w.astype(jnp.bfloat16), b, out_dim=128))
    _check(out, ref, 1e-1, 1e-1, "bf16 operands")

    print("KERNEL_OK")
</pallas_src>

<mosaic_0001>
module attributes {stable_mosaic.version = 11 : i64} {
  func.func @_glu_kernel(%arg0: i32, %arg1: i32, %arg2: memref<64x128xf32, #tpu.memory_space<vmem>>, %arg3: memref<128x256xf32, #tpu.memory_space<vmem>>, %arg4: memref<1x256xf32, #tpu.memory_space<vmem>>, %arg5: memref<64x128xf32, #tpu.memory_space<vmem>>, %arg6: memref<64x256xf32, #tpu.memory_space<vmem>>) attributes {dimension_semantics = [#tpu.dimension_semantics<parallel>, #tpu.dimension_semantics<arbitrary>], iteration_bounds = array<i64: 4, 1>, scalar_prefetch = 0 : i64, scratch_operands = 1 : i64, tpu.core_type = #tpu.core_type<tc>, window_params = [{transform_indices = @transform_0, window_bounds = array<i64: 64, 128>}, {pipeline_mode = #tpu.pipeline_mode<synchronous>, transform_indices = @transform_1, window_bounds = array<i64: 128, 256>}, {pipeline_mode = #tpu.pipeline_mode<synchronous>, transform_indices = @transform_2, window_bounds = array<i64: 1, 256>}, {transform_indices = @transform_3, window_bounds = array<i64: 64, 128>}]} {
    %c0_i32 = arith.constant 0 : i32
    %0 = arith.cmpi eq, %arg1, %c0_i32 : i32
    %1 = arith.extui %0 : i1 to i32
    %c0_i32_0 = arith.constant 0 : i32
    %2 = arith.cmpi ne, %1, %c0_i32_0 : i32
    scf.if %2 {
      %cst_10 = arith.constant 0.000000e+00 : f32
      %12 = vector.broadcast %cst_10 : f32 to vector<64x256xf32>
      %c0_11 = arith.constant 0 : index
      %c0_12 = arith.constant 0 : index
      %13 = vector.load %arg6[%c0_11, %c0_12] : memref<64x256xf32, #tpu.memory_space<vmem>>, vector<64x256xf32>
      tpu.vector_store %arg6[%c0_11, %c0_12], %12 {strides = array<i32>} : memref<64x256xf32, #tpu.memory_space<vmem>>, vector<64x256xf32>,
    } else {
    }
    %c0 = arith.constant 0 : index
    %c0_1 = arith.constant 0 : index
    %3 = vector.load %arg6[%c0, %c0_1] : memref<64x256xf32, #tpu.memory_space<vmem>>, vector<64x256xf32>
    %c0_2 = arith.constant 0 : index
    %c0_3 = arith.constant 0 : index
    %4 = vector.load %arg2[%c0_2, %c0_3] : memref<64x128xf32, #tpu.memory_space<vmem>>, vector<64x128xf32>
    %c0_4 = arith.constant 0 : index
    %c0_5 = arith.constant 0 : index
    %5 = vector.load %arg3[%c0_4, %c0_5] : memref<128x256xf32, #tpu.memory_space<vmem>>, vector<128x256xf32>
    %cst = arith.constant dense<0.000000e+00> : vector<64x256xf32>
    %6 = tpu.matmul %4, %5, %cst {dimension_numbers = #tpu.dot_dimension_numbers<[1], [0], [0], [1], [0, 0, 1, 1], [], []>} : vector<64x128xf32>, vector<128x256xf32>, vector<64x256xf32> -> vector<64x256xf32>
    %7 = arith.addf %3, %6 : vector<64x256xf32>
    %c0_6 = arith.constant 0 : index
    %c0_7 = arith.constant 0 : index
    %8 = vector.load %arg6[%c0_6, %c0_7] : memref<64x256xf32, #tpu.memory_space<vmem>>, vector<64x256xf32>
    tpu.vector_store %arg6[%c0_6, %c0_7], %7 {strides = array<i32>} : memref<64x256xf32, #tpu.memory_space<vmem>>, vector<64x256xf32>,
    %c0_i32_8 = arith.constant 0 : i32
    %9 = arith.cmpi eq, %arg1, %c0_i32_8 : i32
    %10 = arith.extui %9 : i1 to i32
    %c0_i32_9 = arith.constant 0 : i32
    %11 = arith.cmpi ne, %10, %c0_i32_9 : i32
    scf.if %11 {
      %c0_10 = arith.constant 0 : index
      %c0_11 = arith.constant 0 : index
      %12 = vector.load %arg6[%c0_10, %c0_11] : memref<64x256xf32, #tpu.memory_space<vmem>>, vector<64x256xf32>
      %c0_12 = arith.constant 0 : index
      %c0_13 = arith.constant 0 : index
      %13 = vector.load %arg4[%c0_12, %c0_13] : memref<1x256xf32, #tpu.memory_space<vmem>>, vector<1x256xf32>
      %14 = vector.broadcast %13 : vector<1x256xf32> to vector<64x256xf32>
      %15 = arith.addf %12, %14 : vector<64x256xf32>
      %cst_14 = arith.constant dense<0.000000e+00> : vector<64xf32>
      %16 = vector.multi_reduction <add>, %15, %cst_14 [1] : vector<64x256xf32> to vector<64xf32>
      %17 = vector.shape_cast %16 : vector<64xf32> to vector<64x1xf32>
      %cst_15 = arith.constant 3.906250e-03 : f32
      %18 = vector.broadcast %cst_15 : f32 to vector<64x1xf32>
      %19 = arith.mulf %17, %18 : vector<64x1xf32>
      %20 = arith.mulf %15, %15 : vector<64x256xf32>
      %cst_16 = arith.constant dense<0.000000e+00> : vector<64xf32>
      %21 = vector.multi_reduction <add>, %20, %cst_16 [1] : vector<64x256xf32> to vector<64xf32>
      %22 = vector.shape_cast %21 : vector<64xf32> to vector<64x1xf32>
      %cst_17 = arith.constant 3.906250e-03 : f32
      %23 = vector.broadcast %cst_17 : f32 to vector<64x1xf32>
      %24 = arith.mulf %22, %23 : vector<64x1xf32>
      %25 = arith.mulf %19, %19 : vector<64x1xf32>
      %26 = arith.subf %24, %25 : vector<64x1xf32>
      %cst_18 = arith.constant 0.000000e+00 : f32
      %27 = vector.broadcast %cst_18 : f32 to vector<64x1xf32>
      %28 = arith.maximumf %26, %27 : vector<64x1xf32>
      %cst_19 = arith.constant 9.99999974E-6 : f32
      %29 = vector.broadcast %cst_19 : f32 to vector<64x1xf32>
      %30 = arith.addf %28, %29 : vector<64x1xf32>
      %31 = math.rsqrt %30 : vector<64x1xf32>
      %32 = vector.extract_strided_slice %15 {offsets = [0, 0], sizes = [64, 128], strides = [1, 1]} : vector<64x256xf32> to vector<64x128xf32>
      %33 = vector.broadcast %19 : vector<64x1xf32> to vector<64x128xf32>
      %34 = arith.subf %32, %33 : vector<64x128xf32>
      %35 = vector.broadcast %31 : vector<64x1xf32> to vector<64x128xf32>
      %36 = arith.mulf %34, %35 : vector<64x128xf32>
      %37 = vector.extract_strided_slice %15 {offsets = [0, 128], sizes = [64, 128], strides = [1, 1]} : vector<64x256xf32> to vector<64x128xf32>
      %38 = vector.broadcast %19 : vector<64x1xf32> to vector<64x128xf32>
      %39 = arith.subf %37, %38 : vector<64x128xf32>
      %40 = vector.broadcast %31 : vector<64x1xf32> to vector<64x128xf32>
      %41 = arith.mulf %39, %40 : vector<64x128xf32>
      %42 = arith.negf %41 : vector<64x128xf32>
      %43 = math.exp %42 : vector<64x128xf32>
      %cst_20 = arith.constant 1.000000e+00 : f32
      %44 = vector.broadcast %cst_20 : f32 to vector<64x128xf32>
      %45 = arith.addf %44, %43 : vector<64x128xf32>
      %46 = arith.divf %44, %45 : vector<64x128xf32>
      %47 = arith.mulf %36, %46 : vector<64x128xf32>
      %c0_21 = arith.constant 0 : index
      %c0_22 = arith.constant 0 : index
      %48 = vector.load %arg5[%c0_21, %c0_22] : memref<64x128xf32, #tpu.memory_space<vmem>>, vector<64x128xf32>
      tpu.vector_store %arg5[%c0_21, %c0_22], %47 {strides = array<i32>} : memref<64x128xf32, #tpu.memory_space<vmem>>, vector<64x128xf32>,
    } else {
    }
    return
  }
  func.func @transform_0(%arg0: i32, %arg1: i32) -> (i32, i32) {
    %c0_i32 = arith.constant 0 : i32
    return %arg0, %arg1 : i32, i32
  }
  func.func @transform_1(%arg0: i32, %arg1: i32) -> (i32, i32) {
    %c0_i32 = arith.constant 0 : i32
    %c0_i32_0 = arith.constant 0 : i32
    return %arg1, %c0_i32 : i32, i32
  }
  func.func @transform_2(%arg0: i32, %arg1: i32) -> (i32, i32) {
    %c0_i32 = arith.constant 0 : i32
    %c0_i32_0 = arith.constant 0 : i32
    %c0_i32_1 = arith.constant 0 : i32
    return %c0_i32, %c0_i32_0 : i32, i32
  }
  func.func @transform_3(%arg0: i32, %arg1: i32) -> (i32, i32) {
    %c0_i32 = arith.constant 0 : i32
    %c0_i32_0 = arith.constant 0 : i32
    return %arg0, %c0_i32 : i32, i32
  }
}

</mosaic_0001>

<bundles_post_ra>
// kernel: tpu_custom_call.1
= control target key start
LH: loop header
LB: loop body
LE: loop exit
PB: predicated region body
PF: predicated region fallthrough
CT: control target
= control target key end

     0   :  { %s1855_s0 = inlined_call_operand.hbm [shape: f32[256,128], index: 0, kind: input, shape index: {}]   ;;  %s1856_s1 = inlined_call_operand.hbm [shape: f32[128,256], index: 1, kind: input, shape index: {}]   ;;  %s1857_s2 = inlined_call_operand.hbm [shape: f32[1,256], index: 2, kind: input, shape index: {}]   ;;  %s1858_s3 = inlined_call_operand.hbm [shape: f32[256,128], index: 3, kind: output, shape index: {}]  }
   0x1   :  { %1859 = sst [smem:[#allocation13_spill]] %s1856_s1 }
   0x2   :  { %8 = vsyncpa [#allocation4], 0 }
   0x3   :  { %10 = vsyncpa [#allocation4 + $0x1], 0 }
   0x4   :  { %11 = vsyncpa [#allocation7], 0 }
   0x5   :  { %12 = vsyncpa [#allocation5], 0 }
   0x6   :  { %14 = vsyncpa [#allocation5 + $0x1], 0  ;;  %s1396_s12 = smov 0   ;;  %s1398_s13 = smov 0  }
   0x7   :  { %s1400_s14 = smov 0   ;;  %s1402_s15 = smov 0  }
   0x8   :  { %s1404_s16 = smov 0   ;;  %s1406_s17 = smov 0  }
   0x9 LB: > { %s992_s18 = sadd.s32 4294967295, %s1366_s17   ;;  %s993_s19 = sadd.s32 4294967294, %s1366_s17   ;;  %s1366_s17 = sphi %s1406_s17, %s20_s17   ;;  %s1362_s16 = sphi %s1404_s16, %s1872_s16   ;;  %s1358_s15 = sphi %s1402_s15, %s1871_s15   ;;  %s1354_s14 = sphi %s1400_s14, %s1870_s14   ;;  %s1350_s13 = sphi %s1398_s13, %s1869_s13   ;;  %s1346_s12 = sphi %s1396_s12, %s1868_s12  }
   0xa   : > { %p54_p0 = scmp.ne.s32.totalorder %s1350_s13, %s1346_s12  ;;  %p1430_p1 = scmp.eq.s32.totalorder %s992_s18, 0 }
   0xb   : > { %p1434_p2 = scmp.eq.s32.totalorder %s992_s18, 3  ;;  %p131_p3 = scmp.eq.s32.totalorder %s993_s19, 3 }
   0xc   : > { %p1440_p4 = por %p1430_p1, %p54_p0  ;;  %p994_p5 = scmp.ge.s32.totalorder %s1366_s17, 1 }
   0xd   : > { %p1445_p6 = por %p131_p3, %p54_p0  ;;  %p138_p7 = scmp.lt.s32.totalorder %s1366_s17, 5 }
   0xe   : > { %s1864_s1 = sld [smem:[#allocation13_spill]]  ;;  %s1368_s28 = smov [#allocation6]  }
   0xf   : > { %p1453_p8 = pnand %p994_p5, %p138_p7  ;;  %s155_s29 = sshll.u32 %s1368_s28, 4  ;;  %s156_s29 = int_to_ptr.vmem [resolvable:$true] %s155_s29 }
  0x10   : > { %s168_s5 = sshll.u32 %s1857_s2, 4  ;;  %s1369_s6 = smov 256   ;;  %s169_s5 = int_to_ptr.hbm [resolvable:$true] %s168_s5 }
  0x11   : > { %p1065_p9 = pneg %p1453_p8  ;;  %s1370_s7 = smov 16  }
  0x12   : > { %s1371_s8 = smov [#allocation8]   ;;  %s32_s10 = sadd.s32 1, %s1362_s16 }
  0x13   : > { %p1066_p10 = pnand %p1065_p9, %p1430_p1  ;;  %s170_s9 = sshll.u32 %s1371_s8, 4  ;;  %s171_s9 = int_to_ptr.vmem [resolvable:$true] %s170_s9 }
  0x14   : > { %s153_s26 = sshll.u32 %s1864_s1, 4  ;;  %s41_s11 = sadd.s32 1, %s1354_s14  ;;  %s154_s26 = int_to_ptr.hbm [resolvable:$true] %s153_s26 }
  0x15   : > { %1068 = dma.hbm_to_vmem [thread:$0]  (!%p1066_p10), %s154_s26, 4096, %s156_s29, [#allocation7], %s1369_s6, %s1369_s6, %s1370_s7  }
  0x16   : > { %1071 = dma.hbm_to_vmem [thread:$0]  (!%p1066_p10), %s169_s5, 32, %s171_s9, [#allocation7]  }
  0x17   : > { %p34_p11 = scmp.ge.s32.totalorder %s32_s10, 4  ;;  %p48_p12 = scmp.ne.s32.totalorder %s1354_s14, %s1350_s13 }
  0x18   : > { %p49_p13 = scmp.eq.s32.totalorder %s1366_s17, 0  ;;  %p1082_p0 = scmp.lt.s32.totalorder %s1366_s17, 4 }
  0x19   : > { %s1874_s10 = smov (%p34_p11, %s32_s10), 0  ;;  %p1478_p5 = por %p1434_p2, %p48_p12 }
  0x1a   : > { %p1472_p3 = por %p49_p13, %p48_p12  ;;  %s36_s24 = ssub.s32 %s1362_s16, %s1874_s10 }
  0x1b   : > { %s181_s25 = sand.u32 1, %s1354_s14   ;;  %p39_p7 = scmp.eq.s32.totalorder %s36_s24, 0 }
  0x1c   : > { %s998_s26 = sshll.u32 %s181_s25, 6  ;;  %s1019_s28 = sshll.u32 %s1362_s16, 6 }
  0x1d   : > { %s1487_s29 = scalar_select %p39_p7, %s1354_s14, %s41_s11  }
  0x1e   : > { %s191_s5 = scalar_lea.hbm %s1855_s0, %s1019_s28  ;;  %s185_s7 = scalar_lea.vmem [#allocation3], %s998_s26 }
  0x1f   : > { %s192_s6 = sshll.u32 %s191_s5, 4  ;;  %s194_s8 = sshll.u32 %s185_s7, 4  ;;  %s193_s6 = int_to_ptr.hbm [resolvable:$true] %s192_s6  ;;  %s195_s8 = int_to_ptr.vmem [resolvable:$true] %s194_s8 }
  0x20   : > { %p1073_p2 = pnand %p1082_p0, %p1472_p3  ;;  %s182_s21 = scalar_lea.sflag [#allocation4], %s181_s25 }
  0x21   : > { %s1372_s9 = smov 128   ;;  %s1373_s1 = smov 8  }
  0x22   : > { %1075 = dma.hbm_to_vmem [thread:$0]  (!%p1073_p2), %s193_s6, 1024, %s195_s8, %s182_s21, %s1372_s9, %s1372_s9, %s1373_s1  }
  0x23   : > { %206 = sbr.rel (%p1453_p8) target bundleno = 436 (0x1b4), region = 32  ;;  %s1499_s11 = sand.u32 (!%p1453_p8), 1, %s1350_s13  }
  0x24   : > { %s1002_s24 = sshll.u32 (!%p1453_p8), %s1499_s11, 6  ;;  %s209_s26 = scalar_lea.sflag (!%p1453_p8), [#allocation4], %s1499_s11 }
  0x25   : > { %s1505_s18 = scalar_lea.vmem (!%p1453_p8), [#allocation3], %s1002_s24 }
  0x28   : > { %1333 = dma.done.wait (%p1440_p4), %s209_s26, 1024  }
  0x29   : > { %1335 = vsyncadd (%p1440_p4), %s209_s26, 4294966272 }
  0x2a   : > { %1337 = dma.done.wait (%p1430_p1), [#allocation7], 4128  }
  0x2b   : > { %1339 = vsyncadd (%p1430_p1), [#allocation7], 4294963168  ;;  %v323_v0 = vld [vmem:[#allocation6 + $0xf0] sm:$0xff]  ;;  %v324_v1 = vld [vmem:[#allocation6 + $0xf8] sm:$0xff]  ;;  %s1717_s1 = scalar_lea.vmem [#allocation9], %s1002_s24  ;;  %s1020_s20 = sshll.u32 %s1358_s15, 6 }
  0x2c   : > { %v321_v2 = vld [vmem:[#allocation6 + $0xe0] sm:$0xff]  ;;  %325 = vmatpush.msra.mxu0 %v323_v0  ;;  %366 = vmatpush.msra.mxu1 %v324_v1  ;;  %v322_v3 = vld [vmem:[#allocation6 + $0xe8] sm:$0xff]  ;;  %v319_v4 = vld [vmem:[#allocation6 + $0xd0] sm:$0xff]  ;;  %s884_s25 = scalar_lea.hbm %s1858_s3, %s1020_s20  ;;  %s885_s15 = sshll.u32 %s1717_s1, 4  ;;  %s886_s15 = int_to_ptr.vmem [resolvable:$true] %s885_s15 }
  0x2d   : > { %1021 = vmatpush.msra.mxu2 %v323_v0  ;;  %1037 = vmatpush.msra.mxu3 %v324_v1  ;;  %v320_v5 = vld [vmem:[#allocation6 + $0xd8] sm:$0xff]  ;;  %v317_v6 = vld [vmem:[#allocation6 + $0xc0] sm:$0xff]  ;;  %v318_v7 = vld [vmem:[#allocation6 + $0xc8] sm:$0xff]  ;;  %s887_s28 = sshll.u32 %s884_s25, 4  ;;  %s873_s30 = scalar_lea.sflag [#allocation5], %s1499_s11  ;;  %s888_s28 = int_to_ptr.hbm [resolvable:$true] %s887_s28 }
  0x2e   : > { %326 = vmatpush.msra.mxu0 %v321_v2  ;;  %367 = vmatpush.msra.mxu1 %v322_v3  ;;  %v315_v8 = vld [vmem:[#allocation6 + $0xb0] sm:$0xff]  ;;  %v316_v9 = vld [vmem:[#allocation6 + $0xb8] sm:$0xff]  ;;  %v313_v10 = vld [vmem:[#allocation6 + $0xa0] sm:$0xff]  ;;  %s1294_s4 = sshra.s32 %s888_s28, 4  ;;  %s1300_s8 = scalar_lea.hbm %s1858_s3, 256  ;;  %s1295_s4 = int_to_ptr.hbm [resolvable:$true] %s1294_s4 }
  0x2f   : > { %1022 = vmatpush.msra.mxu2 %v321_v2  ;;  %1038 = vmatpush.msra.mxu3 %v322_v3  ;;  %v314_v11 = vld [vmem:[#allocation6 + $0xa8] sm:$0xff]  ;;  %v311_v12 = vld [vmem:[#allocation6 + $0x90] sm:$0xff]  ;;  %v312_v13 = vld [vmem:[#allocation6 + $0x98] sm:$0xff]  ;;  %s1296_s5 = scalar_lea.hbm %s1295_s4, 64  ;;  %p1301_p9 = scmp.lt.s32.totalorder %s1295_s4, %s1858_s3 }
  0x30   : > { %327 = vmatpush.msra.mxu0 %v319_v4  ;;  %368 = vmatpush.msra.mxu1 %v320_v5  ;;  %v309_v14 = vld [vmem:[#allocation6 + $0x80] sm:$0xff]  ;;  %v310_v15 = vld [vmem:[#allocation6 + $0x88] sm:$0xff]  ;;  %v307_v16 = vld [vmem:[#allocation6 + $0x70] sm:$0xff]  ;;  %p1297_p1 = scmp.ne.s32.totalorder %s1295_s4, %s1296_s5  ;;  %p1302_p10 = scmp.lt.s32.totalorder %s1300_s8, %s1296_s5 }
  0x31   : > { %1023 = vmatpush.msra.mxu2 %v319_v4  ;;  %1039 = vmatpush.msra.mxu3 %v320_v5  ;;  %v308_v17 = vld [vmem:[#allocation6 + $0x78] sm:$0xff]  ;;  %v305_v18 = vld [vmem:[#allocation6 + $0x60] sm:$0xff]  ;;  %v306_v19 = vld [vmem:[#allocation6 + $0x68] sm:$0xff] }
  0x32   : > { %328 = vmatpush.msra.mxu0 %v317_v6  ;;  %369 = vmatpush.msra.mxu1 %v318_v7  ;;  %v303_v20 = vld [vmem:[#allocation6 + $0x50] sm:$0xff]  ;;  %v304_v21 = vld [vmem:[#allocation6 + $0x58] sm:$0xff]  ;;  %v301_v22 = vld [vmem:[#allocation6 + $0x40] sm:$0xff]  ;;  %p1298_p4 = pnand %p1297_p1, %p1478_p5  ;;  %p1303_p11 = por %p1302_p10, %p1301_p9 }
  0x33   : > { %1024 = vmatpush.msra.mxu2 %v317_v6  ;;  %1040 = vmatpush.msra.mxu3 %v318_v7  ;;  %v302_v23 = vld [vmem:[#allocation6 + $0x48] sm:$0xff]  ;;  %v299_v24 = vld [vmem:[#allocation6 + $0x30] sm:$0xff]  ;;  %v300_v25 = vld [vmem:[#allocation6 + $0x38] sm:$0xff] }
  0x34   : > { %329 = vmatpush.msra.mxu0 %v315_v8  ;;  %370 = vmatpush.msra.mxu1 %v316_v9  ;;  %v297_v26 = vld [vmem:[#allocation6 + $0x20] sm:$0xff]  ;;  %v298_v27 = vld [vmem:[#allocation6 + $0x28] sm:$0xff]  ;;  %v295_v28 = vld [vmem:[#allocation6 + $0x10] sm:$0xff]  ;;  %p1299_p8 = pneg %p1298_p4 }
  0x35   : > { %1025 = vmatpush.msra.mxu2 %v315_v8  ;;  %1041 = vmatpush.msra.mxu3 %v316_v9  ;;  %v296_v29 = vld [vmem:[#allocation6 + $0x18] sm:$0xff]  ;;  %v293_v30 = vld [vmem:[#allocation6] sm:$0xff]  ;;  %v294_v31 = vld [vmem:[#allocation6 + $0x8] sm:$0xff] }
  0x36   : > { %330 = vmatpush.msra.mxu0 %v313_v10  ;;  %371 = vmatpush.msra.mxu1 %v314_v11  ;;  %v285_v32 = vld [vmem:[%s1505_s18] sm:$0xff]  ;;  %v286_v34 = vld [vmem:[%s1505_s18 + $0x8] sm:$0xff]  ;;  %v287_v36 = vld [vmem:[%s1505_s18 + $0x10] sm:$0xff]  ;;  %p1304_p12 = pnand %p1303_p11, %p1299_p8 }
  0x37   : > { %1026 = vmatpush.msra.mxu2 %v313_v10  ;;  %1042 = vmatpush.msra.mxu3 %v314_v11  ;;  %v289_v33 = vld [vmem:[%s1505_s18 + $0x20] sm:$0xff]  ;;  %v290_v35 = vld [vmem:[%s1505_s18 + $0x28] sm:$0xff]  ;;  %v291_v37 = vld [vmem:[%s1505_s18 + $0x30] sm:$0xff] }
  0x38   : > { %331 = vmatpush.msra.mxu0 %v311_v12  ;;  %372 = vmatpush.msra.mxu1 %v312_v13  ;;  %v288_v38 = vld [vmem:[%s1505_s18 + $0x18] sm:$0xff]  ;;  %v458_v40 = vld [vmem:[#allocation8] sm:$0x3] }
  0x39   : > { %1027 = vmatpush.msra.mxu2 %v311_v12  ;;  %1043 = vmatpush.msra.mxu3 %v312_v13  ;;  %v292_v39 = vld [vmem:[%s1505_s18 + $0x38] sm:$0xff]  ;;  %v1523_v41 = vperm.slane %v458_v40, 0  ;;  %v1525_v42 = vperm.slane %v458_v40, 1 }
  0x3a   : > { %332 = vmatpush.msra.mxu0 %v309_v14  ;;  %373 = vmatpush.msra.mxu1 %v310_v15 }
  0x3b   : > { %1028 = vmatpush.msra.mxu2 %v309_v14  ;;  %1044 = vmatpush.msra.mxu3 %v310_v15 }
  0x3c   : > { %333 = vmatpush.msra.mxu0 %v307_v16  ;;  %374 = vmatpush.msra.mxu1 %v308_v17 }
  0x3d   : > { %1029 = vmatpush.msra.mxu2 %v307_v16  ;;  %1045 = vmatpush.msra.mxu3 %v308_v17 }
  0x3e   : > { %334 = vmatpush.msra.mxu0 %v305_v18  ;;  %375 = vmatpush.msra.mxu1 %v306_v19 }
  0x3f   : > { %1030 = vmatpush.msra.mxu2 %v305_v18  ;;  %1046 = vmatpush.msra.mxu3 %v306_v19 }
  0x40   : > { %335 = vmatpush.msra.mxu0 %v303_v20  ;;  %376 = vmatpush.msra.mxu1 %v304_v21 }
  0x41   : > { %1031 = vmatpush.msra.mxu2 %v303_v20  ;;  %1047 = vmatpush.msra.mxu3 %v304_v21 }
  0x42   : > { %336 = vmatpush.msra.mxu0 %v301_v22  ;;  %377 = vmatpush.msra.mxu1 %v302_v23 }
  0x43   : > { %1032 = vmatpush.msra.mxu2 %v301_v22  ;;  %1048 = vmatpush.msra.mxu3 %v302_v23 }
  0x44   : > { %337 = vmatpush.msra.mxu0 %v299_v24  ;;  %378 = vmatpush.msra.mxu1 %v300_v25 }
  0x45   : > { %1033 = vmatpush.msra.mxu2 %v299_v24  ;;  %1049 = vmatpush.msra.mxu3 %v300_v25 }
  0x46   : > { %338 = vmatpush.msra.mxu0 %v297_v26  ;;  %379 = vmatpush.msra.mxu1 %v298_v27 }
  0x47   : > { %1034 = vmatpush.msra.mxu2 %v297_v26  ;;  %1050 = vmatpush.msra.mxu3 %v298_v27 }
  0x48   : > { %339 = vmatpush.msra.mxu0 %v295_v28  ;;  %380 = vmatpush.msra.mxu1 %v296_v29 }
  0x49   : > { %1035 = vmatpush.msra.mxu2 %v295_v28  ;;  %1051 = vmatpush.msra.mxu3 %v296_v29 }
  0x4a   : > { %340 = vmatpush.msra.mxu0 %v293_v30  ;;  %381 = vmatpush.msra.mxu1 %v294_v31 }
  0x4b   : > { %341 = vmatmul.f32.vlgmr.msra.gmra.mxu0 %v285_v32  ;;  %382 = vmatmul.f32.vlgmr.msra.gmra.mxu1 %v285_v32 }
  0x4c   : > { %1036 = vmatpush.msra.mxu2 %v293_v30  ;;  %1052 = vmatpush.msra.mxu3 %v294_v31 }
  0x4d   : > { %353 = vmatmul.f32.vlgmr.msra.gmra.mxu2 %v289_v33  ;;  %394 = vmatmul.f32.vlgmr.msra.gmra.mxu3 %v289_v33 }
  0x53   : > { %344 = vmatmul.f32.gmra.mxu0 %v286_v34  ;;  %385 = vmatmul.f32.gmra.mxu1 %v286_v34 }
  0x55   : > { %356 = vmatmul.f32.gmra.mxu2 %v290_v35  ;;  %397 = vmatmul.f32.gmra.mxu3 %v290_v35 }
  0x5b   : > { %347 = vmatmul.f32.gmra.mxu0 %v287_v36  ;;  %388 = vmatmul.f32.gmra.mxu1 %v287_v36 }
  0x5d   : > { %359 = vmatmul.f32.gmra.mxu2 %v291_v37  ;;  %400 = vmatmul.f32.gmra.mxu3 %v291_v37 }
  0x63   : > { %350 = vmatmul.f32.gmra.mxu0 %v288_v38  ;;  %391 = vmatmul.f32.gmra.mxu1 %v288_v38 }
  0x65   : > { %362 = vmatmul.f32.gmra.mxu2 %v292_v39  ;;  %403 = vmatmul.f32.gmra.mxu3 %v292_v39 }
  0xc8   : > { %v342_v43 = vpop.f32.mrf.mxu0  ;;  %v383_v44 = vpop.f32.mrf.mxu1 }
  0xc9   : > { %v1528_v45 = vadd.f32 %v1523_v41, %v342_v43  ;;  %v1531_v46 = vadd.f32 %v1525_v42, %v383_v44 }
  0xcb   : > { %v480_v47 = vadd.f32 %v1531_v46, %v1528_v45  ;;  %v512_v48 = vmul.f32 %v1528_v45, %v1528_v45  ;;  %v513_v49 = vmul.f32 %v1531_v46, %v1531_v46 }
  0xcd   : > { %481 = vadd.xlane.f32.xlu0 %v480_v47  ;;  %v528_v50 = vadd.f32 %v513_v49, %v512_v48 }
  0xcf   : > { %529 = vadd.xlane.f32.xlu2 %v528_v50 }
  0xd0   : > { %v345_v51 = vpop.f32.mrf.mxu0  ;;  %v386_v52 = vpop.f32.mrf.mxu1 }
  0xd1   : > { %v1540_v53 = vadd.f32 %v1523_v41, %v345_v51  ;;  %v1543_v54 = vadd.f32 %v1525_v42, %v386_v52  ;;  %v354_v55 = vpop.f32.mrf.mxu2  ;;  %v395_v56 = vpop.f32.mrf.mxu3 }
  0xd2   : > { %v1546_v57 = vadd.f32 %v1523_v41, %v354_v55  ;;  %v1549_v58 = vadd.f32 %v1525_v42, %v395_v56 }
  0xd3   : > { %v483_v59 = vadd.f32 %v1543_v54, %v1540_v53  ;;  %v514_v10 = vmul.f32 %v1540_v53, %v1540_v53  ;;  %v515_v11 = vmul.f32 %v1543_v54, %v1543_v54 }
  0xd4   : > { %v492_v60 = vadd.f32 %v1549_v58, %v1546_v57  ;;  %v520_v61 = vmul.f32 %v1546_v57, %v1546_v57  ;;  %v521_v62 = vmul.f32 %v1549_v58, %v1549_v58 }
  0xd5   : > { %484 = vadd.xlane.f32.xlu0 %v483_v59  ;;  %v531_v20 = vadd.f32 %v515_v11, %v514_v10 }
  0xd6   : > { %v540_v5 = vadd.f32 %v521_v62, %v520_v61 }
  0xd7   : > { %493 = vadd.xlane.f32.xlu2 %v492_v60 }
  0xd8   : > { %v348_v63 = vpop.f32.mrf.mxu0  ;;  %v389_v0 = vpop.f32.mrf.mxu1 }
  0xd9   : > { %v1560_v1 = vadd.f32 %v1523_v41, %v348_v63  ;;  %v1563_v2 = vadd.f32 %v1525_v42, %v389_v0  ;;  %v357_v3 = vpop.f32.mrf.mxu2  ;;  %v398_v4 = vpop.f32.mrf.mxu3 }
  0xda   : > { %v1566_v6 = vadd.f32 %v1523_v41, %v357_v3  ;;  %v1569_v7 = vadd.f32 %v1525_v42, %v398_v4 }
  0xdb   : > { %v486_v8 = vadd.f32 %v1563_v2, %v1560_v1  ;;  %v516_v12 = vmul.f32 %v1560_v1, %v1560_v1  ;;  %v517_v13 = vmul.f32 %v1563_v2, %v1563_v2 }
  0xdc   : > { %v495_v9 = vadd.f32 %v1569_v7, %v1566_v6  ;;  %v522_v40 = vmul.f32 %v1566_v6, %v1566_v6 }
  0xdd   : > { %541 = vadd.xlane.f32.xlu0 %v540_v5  ;;  %487 = vadd.xlane.f32.xlu1 %v486_v8  ;;  %v534_v21 = vadd.f32 %v517_v13, %v516_v12 }
  0xdf   : > { %496 = vadd.xlane.f32.xlu2 %v495_v9 }
  0xe0   : > { %v351_v14 = vpop.f32.mrf.mxu0  ;;  %v392_v15 = vpop.f32.mrf.mxu1 }
  0xe1   : > { %v1584_v16 = vadd.f32 %v1523_v41, %v351_v14  ;;  %v1587_v17 = vadd.f32 %v1525_v42, %v392_v15  ;;  %v360_v18 = vpop.f32.mrf.mxu2  ;;  %v401_v19 = vpop.f32.mrf.mxu3 }
  0xe2   : > { %v1594_v24 = vadd.f32 %v1523_v41, %v360_v18  ;;  %v1597_v25 = vadd.f32 %v1525_v42, %v401_v19 }
  0xe3   : > { %v518_v22 = vmul.f32 %v1584_v16, %v1584_v16  ;;  %v519_v23 = vmul.f32 %v1587_v17, %v1587_v17  ;;  %v489_v30 = vadd.f32 %v1587_v17, %v1584_v16 }
  0xe4   : > { %v524_v27 = vmul.f32 %v1594_v24, %v1594_v24  ;;  %v525_v28 = vmul.f32 %v1597_v25, %v1597_v25  ;;  %v498_v29 = vadd.f32 %v1597_v25, %v1594_v24 }
  0xe5   : > { %532 = vadd.xlane.f32.xlu0 %v531_v20  ;;  %535 = vadd.xlane.f32.xlu1 %v534_v21  ;;  %v537_v26 = vadd.f32 %v519_v23, %v518_v22 }
  0xe6   : > { %v546_v35 = vadd.f32 %v525_v28, %v524_v27 }
  0xe7   : > { %538 = vadd.xlane.f32.xlu2 %v537_v26 }
  0xe9   : > { %v363_v31 = vpop.f32.mrf.mxu2  ;;  %v404_v32 = vpop.f32.mrf.mxu3 }
  0xea   : > { %v1608_v33 = vadd.f32 %v1523_v41, %v363_v31  ;;  %v1611_v34 = vadd.f32 %v1525_v42, %v404_v32  ;;  %v523_v41 = vmul.f32 %v1569_v7, %v1569_v7 }
  0xec   : > { %v526_v36 = vmul.f32 %v1608_v33, %v1608_v33  ;;  %v527_v37 = vmul.f32 %v1611_v34, %v1611_v34  ;;  %v501_v38 = vadd.f32 %v1611_v34, %v1608_v33  ;;  %v543_v42 = vadd.f32 %v523_v41, %v522_v40 }
  0xed   : > { %499 = vadd.xlane.f32.xlu0 %v498_v29  ;;  %490 = vadd.xlane.f32.xlu1 %v489_v30 }
  0xee   : > { %v549_v39 = vadd.f32 %v527_v37, %v526_v36 }
  0xef   : > { %547 = vadd.xlane.f32.xlu2 %v546_v35 }
  0xf5   : > { %502 = vadd.xlane.f32.xlu1 %v501_v38  ;;  %550 = vadd.xlane.f32.xlu0 %v549_v39 }
  0xfd   : > { %544 = vadd.xlane.f32.xlu1 %v543_v42 }
 0x140   : > { %v482_v43 = vpop.xlane.xlu0 %481 }
 0x141   : > { %v1623_v44 = vmul.f32 0.00390625, %v482_v43 }
 0x142   : > { %v530_v47 = vpop.xlane.xlu2 %529 }
 0x143   : > { %v552_v48 = vmul.f32 0.00390625, %v530_v47  ;;  %v560_v49 = vmul.f32 %v1623_v44, %v1623_v44  ;;  %v688_v27 = vsub.f32 %v1531_v46, %v1623_v44 }
 0x145   : > { %v568_v50 = vsub.f32 %v552_v48, %v560_v49 }
 0x147   : > { %v576_v51 = vmax.f32 %v568_v50, 0.0 }
 0x148   : > { %v485_v52 = vpop.xlane.xlu0 %484 }
 0x149   : > { %v584_v55 = vadd.f32 1e-05, %v576_v51  ;;  %v1633_v9 = vmul.f32 0.00390625, %v485_v52 }
 0x14a   : > { %v494_v56 = vpop.xlane.xlu2 %493 }
 0x14b   : > { %1142 = vrsqrt.f32 %v584_v55  ;;  %v1627_v59 = vmul.f32 0.00390625, %v494_v56  ;;  %v561_v15 = vmul.f32 %v1633_v9, %v1633_v9  ;;  %vm598_vm1 = vweird.f32 %v584_v55 }
 0x14d   : > { %v564_v60 = vmul.f32 %v1627_v59, %v1627_v59 }
 0x150   : > { %v542_v61 = vpop.xlane.xlu0 %541  ;;  %v488_v62 = vpop.xlane.xlu1 %487 }
 0x151   : > { %v1143_v63 = vpop.eup %1142  ;;  %v556_v0 = vmul.f32 0.00390625, %v542_v61  ;;  %v1635_v11 = vmul.f32 0.00390625, %v488_v62 }
 0x152   : > { %v593_v3 = vmul.f32 %v1143_v63, %v584_v55  ;;  %v1631_v4 = vpop.xlane.xlu2 %496  ;;  %vm599_vm0 = vweird.f32 %v1143_v63 }
 0x153   : > { %v572_v5 = vsub.f32 %v556_v0, %v564_v60  ;;  %v562_v21 = vmul.f32 %v1635_v11, %v1635_v11  ;;  %vm600_vm2 = vmor %vm598_vm1, %vm599_vm0 }
 0x154   : > { %v594_v8 = vmul.f32 %v1143_v63, %v593_v3 }
 0x155   : > { %v580_v10 = vmax.f32 %v572_v5, 0.0 }
 0x156   : > { %v595_v12 = vmul.f32 0.5, %v594_v8 }
 0x157   : > { %v588_v13 = vadd.f32 1e-05, %v580_v10 }
 0x158   : > { %v596_v14 = vsub.f32 1.5, %v595_v12  ;;  %v533_v18 = vpop.xlane.xlu0 %532  ;;  %v536_v19 = vpop.xlane.xlu1 %535 }
 0x159   : > { %1144 = vrsqrt.f32 %v588_v13  ;;  %v553_v20 = vmul.f32 0.00390625, %v533_v18  ;;  %v554_v22 = vmul.f32 0.00390625, %v536_v19  ;;  %vm638_vm4 = vweird.f32 %v588_v13 }
 0x15a   : > { %v597_v23 = vmul.f32 %v1143_v63, %v596_v14  ;;  %v539_v26 = vpop.xlane.xlu2 %538  ;;  %v692_v14 = vsub.f32 %v1549_v58, %v1627_v59 }
 0x15b   : > { %v569_v28 = vsub.f32 %v553_v20, %v561_v15  ;;  %v570_v29 = vsub.f32 %v554_v22, %v562_v21  ;;  %v555_v47 = vmul.f32 0.00390625, %v539_v26  ;;  %v672_v22 = vsub.f32 %v1528_v45, %v1623_v44 }
 0x15c   : > { %v1643_v30 = vsel %vm600_vm2, %v1143_v63, %v597_v23  ;;  %v689_v26 = vsub.f32 %v1543_v54, %v1633_v9 }
 0x15d   : > { %v696_v31 = vmul.f32 %v688_v27, %v1643_v30  ;;  %v577_v32 = vmax.f32 %v569_v28, 0.0  ;;  %v578_v35 = vmax.f32 %v570_v29, 0.0 }
 0x15f   : > { %v1145_v36 = vpop.eup %1144  ;;  %v1006_v37 = vmul.f32 -1.442695, %v696_v31  ;;  %v1646_v38 = vadd.f32 1e-05, %v577_v32  ;;  %v1648_v39 = vadd.f32 1e-05, %v578_v35 }
 0x160   : > { %v633_v40 = vmul.f32 %v1145_v36, %v588_v13  ;;  %v500_v41 = vpop.xlane.xlu0 %499  ;;  %v491_v42 = vpop.xlane.xlu1 %490  ;;  %vm639_vm3 = vweird.f32 %v1145_v36  ;;  %v1679_v31 = vmul.f32 0.00390625, %v1631_v4 }
 0x161   : > { %1146 = vpow2.f32 %v1006_v37  ;;  %v1650_v46 = vmul.f32 0.00390625, %v500_v41  ;;  %v1653_v48 = vmul.f32 0.00390625, %v491_v42  ;;  %vm640_vm5 = vmor %vm638_vm4, %vm639_vm3  ;;  %vm608_vm7 = vweird.f32 %v1646_v38 }
 0x162   : > { %v634_v43 = vmul.f32 %v1145_v36, %v633_v40  ;;  %1148 = vrsqrt.f32 %v1646_v38  ;;  %v548_v49 = vpop.xlane.xlu2 %547  ;;  %v565_v37 = vmul.f32 %v1679_v31, %v1679_v31  ;;  %vm618_vm10 = vweird.f32 %v1648_v39 }
 0x163   : > { %1150 = vrsqrt.f32 %v1648_v39  ;;  %v566_v50 = vmul.f32 %v1650_v46, %v1650_v46  ;;  %v563_v52 = vmul.f32 %v1653_v48, %v1653_v48  ;;  %v558_v55 = vmul.f32 0.00390625, %v548_v49 }
 0x164   : > { %v635_v51 = vmul.f32 0.5, %v634_v43 }
 0x165   : > { %v571_v60 = vsub.f32 %v555_v47, %v563_v52  ;;  %v574_v62 = vsub.f32 %v558_v55, %v566_v50  ;;  %v690_v55 = vsub.f32 %v1563_v2, %v1635_v11 }
 0x166   : > { %v636_v56 = vsub.f32 1.5, %v635_v51 }
 0x167   : > { %v1147_v61 = vpop.eup %1146  ;;  %v579_v12 = vmax.f32 %v571_v60, 0.0  ;;  %v582_v15 = vmax.f32 %v574_v62, 0.0 }
 0x168   : > { %v1149_v63 = vpop.eup %1148  ;;  %v1660_v0 = vadd.f32 1.0, %v1147_v61  ;;  %v637_v3 = vmul.f32 %v1145_v36, %v636_v56  ;;  %v503_v5 = vpop.xlane.xlu1 %502 }
 0x169   : > { %v1151_v8 = vpop.eup %1150  ;;  %v603_v10 = vmul.f32 %v1149_v63, %v1646_v38  ;;  %v551_v21 = vpop.xlane.xlu0 %550  ;;  %v1672_v23 = vmul.f32 0.00390625, %v503_v5  ;;  %v1676_v28 = vadd.f32 1e-05, %v579_v12  ;;  %v1681_v32 = vadd.f32 1e-05, %v582_v15 }
 0x16a   : > { %1152 = vrcp.f32 %v1660_v0  ;;  %v1666_v18 = vsel %vm640_vm5, %v1145_v36, %v637_v3  ;;  %v613_v20 = vmul.f32 %v1151_v8, %v1648_v39  ;;  %v559_v35 = vmul.f32 0.00390625, %v551_v21 }
 0x16b   : > { %v604_v19 = vmul.f32 %v1149_v63, %v603_v10  ;;  %v700_v13 = vmul.f32 %v692_v14, %v1666_v18  ;;  %vm609_vm6 = vweird.f32 %v1149_v63  ;;  %1154 = vrsqrt.f32 %v1676_v28 }
 0x16c   : > { %v614_v58 = vmul.f32 %v1151_v8, %v613_v20  ;;  %v567_v54 = vmul.f32 %v1672_v23, %v1672_v23  ;;  %vm619_vm8 = vweird.f32 %v1151_v8  ;;  %vm610_vm9 = vmor %vm608_vm7, %vm609_vm6  ;;  %v747_v49 = vand.u32 2147483648, %v1660_v0 }
 0x16d   : > { %v605_v27 = vmul.f32 0.5, %v604_v19  ;;  %v1010_v29 = vmul.f32 -1.442695, %v700_v13  ;;  %v745_v52 = vand.u32 2147483647, %v1660_v0  ;;  %vm620_vm11 = vmor %vm618_vm10, %vm619_vm8  ;;  %vm741_vm13 = vweird.f32 %v1660_v0 }
 0x16e   : > { %v615_v45 = vmul.f32 0.5, %v614_v58  ;;  %v575_v43 = vsub.f32 %v559_v35, %v567_v54  ;;  %v748_v2 = vor.u32 1.1754944e-38, %v747_v49  ;;  %vm628_vm1 = vweird.f32 %v1676_v28 }
 0x16f   : > { %v606_v36 = vsub.f32 1.5, %v605_v27  ;;  %1156 = vpow2.f32 %v1010_v29  ;;  %vm746_vm15 = vcmp.eq.f32.partialorder %v745_v52, 8.507059e+37  ;;  %vm658_vm5 = vweird.f32 %v1681_v32 }
 0x170   : > { %v1153_v44 = vpop.eup %1152  ;;  %v545_v4 = vpop.xlane.xlu1 %544  ;;  %v616_v42 = vsub.f32 1.5, %v615_v45  ;;  %1158 = vrsqrt.f32 %v1681_v32  ;;  %v583_v60 = vmax.f32 %v575_v43, 0.0 }
 0x171   : > { %v737_v40 = vmul.f32 %v1153_v44, %v1660_v0  ;;  %v607_v41 = vmul.f32 %v1149_v63, %v606_v36  ;;  %v557_v47 = vmul.f32 0.00390625, %v545_v4  ;;  %v1155_v39 = vpop.eup %1154  ;;  %vm742_vm12 = vweird.f32 %v1153_v44 }
 0x172   : > { %v617_v51 = vmul.f32 %v1151_v8, %v616_v42  ;;  %v623_v14 = vmul.f32 %v1155_v39, %v1676_v28  ;;  %vm743_vm14 = vmor %vm741_vm13, %vm742_vm12  ;;  %v1709_v13 = vadd.f32 1e-05, %v583_v60  ;;  %vm629_vm0 = vweird.f32 %v1155_v39 }
 0x173   : > { %v738_v38 = vsub.f32 1.0, %v737_v40  ;;  %v1693_v50 = vsel %vm610_vm9, %v1149_v63, %v607_v41  ;;  %v573_v3 = vsub.f32 %v557_v47, %v565_v37  ;;  %v680_v63 = vmul.f32 %v672_v22, %v1643_v30  ;;  %vm630_vm2 = vmor %vm628_vm1, %vm629_vm0 }
 0x174   : > { %v697_v56 = vmul.f32 %v689_v26, %v1693_v50  ;;  %v1699_v62 = vsel %vm620_vm11, %v1151_v8, %v617_v51  ;;  %v624_v21 = vmul.f32 %v1155_v39, %v623_v14  ;;  %v676_v4 = vsub.f32 %v1546_v57, %v1627_v59 }
 0x175   : > { %v739_v61 = vmul.f32 %v1153_v44, %v738_v38  ;;  %v1157_v5 = vpop.eup %1156  ;;  %v698_v12 = vmul.f32 %v690_v55, %v1699_v62  ;;  %v581_v22 = vmax.f32 %v573_v3, 0.0  ;;  %v674_v47 = vsub.f32 %v1560_v1, %v1635_v11 }
 0x176   : > { %v1007_v10 = vmul.f32 -1.442695, %v697_v56  ;;  %v1705_v19 = vadd.f32 1.0, %v1157_v5  ;;  %v1707_v20 = vpop.eup %1158  ;;  %v625_v0 = vmul.f32 0.5, %v624_v21  ;;  %v684_v28 = vmul.f32 %v676_v4, %v1666_v18 }
 0x177   : > { %v740_v15 = vadd.f32 %v1153_v44, %v739_v61  ;;  %v1008_v8 = vmul.f32 -1.442695, %v698_v12  ;;  %v653_v58 = vmul.f32 %v1707_v20, %v1681_v32  ;;  %v1721_v36 = vadd.f32 1e-05, %v581_v22 }
 0x178   : > { %1160 = vpow2.f32 %v1007_v10  ;;  %v626_v29 = vsub.f32 1.5, %v625_v0  ;;  %v693_v57 = vsub.f32 %v1569_v7, %v1679_v31  ;;  %v694_v59 = vsub.f32 %v1597_v25, %v1650_v46 }
 0x179   : > { %v744_v30 = vsel %vm743_vm14, %v1153_v44, %v740_v15  ;;  %1162 = vrcp.f32 %v1705_v19  ;;  %v654_v35 = vmul.f32 %v1707_v20, %v653_v58  ;;  %v673_v44 = vsub.f32 %v1540_v53, %v1633_v9 }
 0x17a   : > { %v749_v26 = vsel %vm746_vm15, %v748_v2, %v744_v30  ;;  %1164 = vpow2.f32 %v1008_v8  ;;  %v627_v54 = vmul.f32 %v1155_v39, %v626_v29  ;;  %v691_v9 = vsub.f32 %v1587_v17, %v1653_v48 }
 0x17b   : > { %v856_v27 = vmul.f32 %v749_v26, %v680_v63  ;;  %1166 = vrsqrt.f32 %v1709_v13  ;;  %v655_v41 = vmul.f32 0.5, %v654_v35  ;;  %v805_v51 = vand.u32 2147483647, %v1705_v19 }
 0x17c   : > { %1168 = vrsqrt.f32 %v1721_v36  ;;  %v1734_v53 = vsel %vm630_vm2, %v1155_v39, %v627_v54  ;;  %v807_v17 = vand.u32 2147483648, %v1705_v19  ;;  %vm659_vm3 = vweird.f32 %v1707_v20 }
 0x17d   : > { %864 = vst [vmem:[%s1717_s1] sm:$0xff] %v856_v27  ;;  %v699_v55 = vmul.f32 %v691_v9, %v1734_v53  ;;  %v656_v56 = vsub.f32 1.5, %v655_v41  ;;  %v695_v25 = vsub.f32 %v1611_v34, %v1672_v23  ;;  %vm801_vm6 = vweird.f32 %v1705_v19  ;;  %vm660_vm8 = vmor %vm658_vm5, %vm659_vm3 }
 0x17e   : > { %v1161_v45 = vpop.eup %1160  ;;  %vm806_vm7 = vcmp.eq.f32.partialorder %v805_v51, 8.507059e+37  ;;  %v808_v14 = vor.u32 1.1754944e-38, %v807_v17  ;;  %v681_v27 = vmul.f32 %v673_v44, %v1693_v50  ;;  %vm668_vm11 = vweird.f32 %v1709_v13 }
 0x17f   : > { %v1163_v37 = vpop.eup %1162  ;;  %v1728_v40 = vadd.f32 1.0, %v1161_v45  ;;  %v1009_v61 = vmul.f32 -1.442695, %v699_v55  ;;  %v657_v3 = vmul.f32 %v1707_v20, %v656_v56  ;;  %vm648_vm5 = vweird.f32 %v1721_v36 }
 0x180   : > { %v1165_v42 = vpop.eup %1164  ;;  %v797_v43 = vmul.f32 %v1163_v37, %v1705_v19  ;;  %vm802_vm4 = vweird.f32 %v1163_v37 }
 0x181   : > { %1170 = vrcp.f32 %v1728_v40  ;;  %v1167_v38 = vpop.eup %1166  ;;  %v1745_v52 = vadd.f32 1.0, %v1165_v42  ;;  %vm803_vm9 = vmor %vm801_vm6, %vm802_vm4  ;;  %v1762_v34 = vsel %vm660_vm8, %v1707_v20, %v657_v3  ;;  %v762_v8 = vand.u32 2147483648, %v1728_v40 }
 0x182   : > { %v798_v49 = vsub.f32 1.0, %v797_v43  ;;  %v663_v18 = vmul.f32 %v1167_v38, %v1709_v13  ;;  %v1754_v39 = vpop.eup %1168  ;;  %vm669_vm10 = vweird.f32 %v1167_v38  ;;  %v702_v21 = vmul.f32 %v694_v59, %v1762_v34 }
 0x183   : > { %1172 = vrcp.f32 %v1745_v52  ;;  %v643_v10 = vmul.f32 %v1754_v39, %v1721_v36  ;;  %vm756_vm12 = vweird.f32 %v1728_v40  ;;  %v760_v54 = vand.u32 2147483647, %v1728_v40  ;;  %vm670_vm14 = vmor %vm668_vm11, %vm669_vm10 }
 0x184   : > { %v799_v60 = vmul.f32 %v1163_v37, %v798_v49  ;;  %v664_v5 = vmul.f32 %v1167_v38, %v663_v18  ;;  %1174 = vpow2.f32 %v1009_v61  ;;  %v1012_v29 = vmul.f32 -1.442695, %v702_v21 }
 0x185   : > { %v644_v22 = vmul.f32 %v1754_v39, %v643_v10  ;;  %v763_v41 = vor.u32 1.1754944e-38, %v762_v8  ;;  %v777_v42 = vand.u32 2147483648, %v1745_v52  ;;  %v775_v59 = vand.u32 2147483647, %v1745_v52 }
 0x186   : > { %v800_v63 = vadd.f32 %v1163_v37, %v799_v60  ;;  %v665_v15 = vmul.f32 0.5, %v664_v5  ;;  %1176 = vpow2.f32 %v1012_v29  ;;  %vm761_vm1 = vcmp.eq.f32.partialorder %v760_v54, 8.507059e+37 }
 0x187   : > { %v1171_v12 = vpop.eup %1170  ;;  %vm649_vm2 = vweird.f32 %v1754_v39  ;;  %vm771_vm3 = vweird.f32 %v1745_v52  ;;  %vm776_vm6 = vcmp.eq.f32.partialorder %v775_v59, 8.507059e+37 }
 0x188   : > { %v804_v2 = vsel %vm803_vm9, %v1163_v37, %v800_v63  ;;  %v752_v32 = vmul.f32 %v1171_v12, %v1728_v40  ;;  %v666_v30 = vsub.f32 1.5, %v665_v15  ;;  %vm757_vm13 = vweird.f32 %v1171_v12 }
 0x189   : > { %v809_v19 = vsel %vm806_vm7, %v808_v14, %v804_v2  ;;  %v1173_v26 = vpop.eup %1172  ;;  %v645_v37 = vmul.f32 0.5, %v644_v22  ;;  %vm758_vm15 = vmor %vm756_vm12, %vm757_vm13  ;;  %v778_v40 = vor.u32 1.1754944e-38, %v777_v42 }
 0x18a   : > { %v860_v0 = vmul.f32 %v809_v19, %v684_v28  ;;  %v753_v20 = vsub.f32 1.0, %v752_v32  ;;  %v767_v58 = vmul.f32 %v1173_v26, %v1745_v52  ;;  %v667_v35 = vmul.f32 %v1167_v38, %v666_v30  ;;  %v1175_v4 = vpop.eup %1174  ;;  %vm650_vm7 = vmor %vm648_vm5, %vm649_vm2 }
 0x18b   : > { %v731_v43 = vadd.f32 1.0, %v1175_v4  ;;  %vm772_vm0 = vweird.f32 %v1173_v26  ;;  %v646_v49 = vsub.f32 1.5, %v645_v37  ;;  %v675_v32 = vsub.f32 %v1584_v16, %v1653_v48 }
 0x18c   : > { %868 = vst [vmem:[%s1717_s1 + $0x20] sm:$0xff] %v860_v0  ;;  %v754_v45 = vmul.f32 %v1171_v12, %v753_v20  ;;  %v768_v50 = vsub.f32 1.0, %v767_v58  ;;  %v1775_v44 = vsel %vm670_vm14, %v1167_v38, %v667_v35  ;;  %vm773_vm4 = vmor %vm771_vm3, %vm772_vm0  ;;  %v1177_v60 = vpop.eup %1176  ;;  %v678_v48 = vsub.f32 %v1594_v24, %v1650_v46 }
 0x18d   : > { %v703_v9 = vmul.f32 %v695_v25, %v1775_v44  ;;  %1178 = vrcp.f32 %v731_v43  ;;  %v647_v18 = vmul.f32 %v1754_v39, %v646_v49  ;;  %v682_v25 = vmul.f32 %v674_v47, %v1699_v62 }
 0x18e   : > { %v755_v13 = vadd.f32 %v1171_v12, %v754_v45  ;;  %v769_v28 = vmul.f32 %v1173_v26, %v768_v50  ;;  %v734_v3 = vadd.f32 1.0, %v1177_v60  ;;  %vm786_vm9 = vweird.f32 %v731_v43 }
 0x18f   : > { %v1013_v17 = vmul.f32 -1.442695, %v703_v9  ;;  %v1794_v5 = vsel %vm650_vm7, %v1754_v39, %v647_v18  ;;  %v790_v39 = vand.u32 2147483647, %v731_v43  ;;  %v683_v21 = vmul.f32 %v675_v32, %v1734_v53 }
 0x190   : > { %v759_v51 = vsel %vm758_vm15, %v1171_v12, %v755_v13  ;;  %v770_v55 = vadd.f32 %v1173_v26, %v769_v28  ;;  %v701_v36 = vmul.f32 %v693_v57, %v1794_v5  ;;  %v792_v12 = vand.u32 2147483648, %v731_v43 }
 0x191   : > { %v764_v38 = vsel %vm761_vm1, %v763_v41, %v759_v51  ;;  %1180 = vpow2.f32 %v1013_v17  ;;  %vm791_vm11 = vcmp.eq.f32.partialorder %v790_v39, 8.507059e+37  ;;  %v837_v0 = vand.u32 2147483648, %v734_v3 }
 0x192   : > { %v857_v56 = vmul.f32 %v764_v38, %v681_v27  ;;  %v774_v61 = vsel %vm773_vm4, %v1173_v26, %v770_v55  ;;  %1182 = vrcp.f32 %v734_v3  ;;  %v1011_v62 = vmul.f32 -1.442695, %v701_v36 }
 0x193   : > { %v779_v52 = vsel %vm776_vm6, %v778_v40, %v774_v61  ;;  %v1179_v1 = vpop.eup %1178  ;;  %v793_v8 = vor.u32 1.1754944e-38, %v792_v12  ;;  %v835_v29 = vand.u32 2147483647, %v734_v3  ;;  %vm831_vm13 = vweird.f32 %v734_v3 }
 0x194   : > { %865 = vst [vmem:[%s1717_s1 + $0x8] sm:$0xff] %v857_v56  ;;  %v858_v63 = vmul.f32 %v779_v52, %v682_v25  ;;  %v782_v11 = vmul.f32 %v1179_v1, %v731_v43  ;;  %1184 = vpow2.f32 %v1011_v62  ;;  %vm787_vm8 = vweird.f32 %v1179_v1 }
 0x195   : > { %vm788_vm10 = vmor %vm786_vm9, %vm787_vm8  ;;  %v838_v45 = vor.u32 1.1754944e-38, %v837_v0  ;;  %v686_v54 = vmul.f32 %v678_v48, %v1762_v34  ;;  %vm836_vm15 = vcmp.eq.f32.partialorder %v835_v29, 8.507059e+37  ;;  %v679_v46 = vsub.f32 %v1608_v33, %v1672_v23 }
 0x196   : > { %866 = vst [vmem:[%s1717_s1 + $0x10] sm:$0xff] %v858_v63  ;;  %v783_v10 = vsub.f32 1.0, %v782_v11  ;;  %v677_v56 = vsub.f32 %v1566_v6, %v1679_v31 }
 0x197   : > { %v1181_v47 = vpop.eup %1180  ;;  %v687_v59 = vmul.f32 %v679_v46, %v1775_v44 }
 0x198   : > { %v735_v14 = vadd.f32 1.0, %v1181_v47  ;;  %v784_v15 = vmul.f32 %v1179_v1, %v783_v10  ;;  %v1183_v2 = vpop.eup %1182  ;;  %v685_v18 = vmul.f32 %v677_v56, %v1794_v5 }
 0x199   : > { %v827_v57 = vmul.f32 %v1183_v2, %v734_v3  ;;  %vm832_vm12 = vweird.f32 %v1183_v2 }
 0x19a   : > { %1186 = vrcp.f32 %v735_v14  ;;  %v785_v7 = vadd.f32 %v1179_v1, %v784_v15  ;;  %v1185_v19 = vpop.eup %1184  ;;  %vm833_vm14 = vmor %vm831_vm13, %vm832_vm12  ;;  %v852_v50 = vand.u32 2147483648, %v735_v14  ;;  %v850_v43 = vand.u32 2147483647, %v735_v14 }
 0x19b   : > { %v828_v22 = vsub.f32 1.0, %v827_v57  ;;  %v733_v27 = vadd.f32 1.0, %v1185_v19  ;;  %vm846_vm1 = vweird.f32 %v735_v14 }
 0x19c   : > { %v789_v30 = vsel %vm788_vm10, %v1179_v1, %v785_v7  ;;  %v853_v34 = vor.u32 1.1754944e-38, %v852_v50  ;;  %vm851_vm3 = vcmp.eq.f32.partialorder %v850_v43, 8.507059e+37 }
 0x19d   : > { %v794_v26 = vsel %vm791_vm11, %v793_v8, %v789_v30  ;;  %v829_v58 = vmul.f32 %v1183_v2, %v828_v22  ;;  %1188 = vrcp.f32 %v733_v27  ;;  %v822_v55 = vand.u32 2147483648, %v733_v27 }
 0x19e   : > { %v859_v20 = vmul.f32 %v794_v26, %v683_v21  ;;  %v820_v17 = vand.u32 2147483647, %v733_v27  ;;  %vm816_vm5 = vweird.f32 %v733_v27 }
 0x19f   : > { %v830_v35 = vadd.f32 %v1183_v2, %v829_v58  ;;  %v823_v40 = vor.u32 1.1754944e-38, %v822_v55 }
 0x1a0   : > { %v1187_v16 = vpop.eup %1186  ;;  %867 = vst [vmem:[%s1717_s1 + $0x18] sm:$0xff] %v859_v20  ;;  %vm821_vm7 = vcmp.eq.f32.partialorder %v820_v17, 8.507059e+37 }
 0x1a1   : > { %v842_v53 = vmul.f32 %v1187_v16, %v735_v14  ;;  %v834_v37 = vsel %vm833_vm14, %v1183_v2, %v830_v35  ;;  %vm847_vm0 = vweird.f32 %v1187_v16 }
 0x1a2   : > { %v839_v41 = vsel %vm836_vm15, %v838_v45, %v834_v37  ;;  %vm848_vm2 = vmor %vm846_vm1, %vm847_vm0 }
 0x1a3   : > { %v843_v4 = vsub.f32 1.0, %v842_v53  ;;  %v862_v13 = vmul.f32 %v839_v41, %v686_v54  ;;  %v1189_v24 = vpop.eup %1188 }
 0x1a4   : > { %v812_v28 = vmul.f32 %v1189_v24, %v733_v27  ;;  %vm817_vm4 = vweird.f32 %v1189_v24 }
 0x1a5   : > { %v844_v42 = vmul.f32 %v1187_v16, %v843_v4  ;;  %870 = vst [vmem:[%s1717_s1 + $0x30] sm:$0xff] %v862_v13  ;;  %vm818_vm6 = vmor %vm816_vm5, %vm817_vm4 }
 0x1a6   : > { %v813_v51 = vsub.f32 1.0, %v812_v28 }
 0x1a7   : > { %v845_v9 = vadd.f32 %v1187_v16, %v844_v42 }
 0x1a8   : > { %v814_v23 = vmul.f32 %v1189_v24, %v813_v51 }
 0x1a9   : > { %v849_v49 = vsel %vm848_vm2, %v1187_v16, %v845_v9 }
 0x1aa   : > { %v854_v38 = vsel %vm851_vm3, %v853_v34, %v849_v49  ;;  %v815_v44 = vadd.f32 %v1189_v24, %v814_v23 }
 0x1ab   : > { %v863_v33 = vmul.f32 %v854_v38, %v687_v59 }
 0x1ac   : > { %v819_v60 = vsel %vm818_vm6, %v1189_v24, %v815_v44 }
 0x1ad   : > { %871 = vst [vmem:[%s1717_s1 + $0x38] sm:$0xff] %v863_v33  ;;  %v824_v25 = vsel %vm821_vm7, %v823_v40, %v819_v60 }
 0x1ae   : > { %v861_v61 = vmul.f32 %v824_v25, %v685_v18 }
 0x1b0   : > { %869 = vst [vmem:[%s1717_s1 + $0x28] sm:$0xff] %v861_v61 }
 0x1b1   : > { %1307 = shalt.err (!%p1304_p12)
}
 0x1b2   : > { %s1374_s11 = smov 128   ;;  %s1375_s24 = smov 8  }
 0x1b3   : > { %1063 = dma.vmem_to_hbm [thread:$0]  (%p1478_p5), %s886_s15, 1024, %s888_s28, %s873_s30, %s1374_s11, %s1374_s11, %s1375_s24  }
 0x1b4 PF: > { %p1085_p13 = scmp.ge.s32.totalorder %s1366_s17, 2  ;;  %s902_s26 = sand.u32 1, %s1346_s12  }
 0x1b5   : > { %s903_s18 = scalar_lea.sflag [#allocation5], %s902_s26 }
 0x1b6   : > { %p1077_p0 = pnand %p1085_p13, %p1445_p6 }
 0x1b8   : > { %p1078_p3 = pneg %p1077_p0 }
 0x1ba   : > { %1341 = dma.done.wait (%p1078_p3), %s903_s18, 1024  }
 0x1bb   : > { %1343 = vsyncadd (%p1078_p3), %s903_s18, 4294966272  ;;  %s20_s17 = sadd.s32 1, %s1366_s17   ;;  %s1868_s12 = smov %s1350_s13 }
 0x1bc   : > { %p17_p7 = scmp.ge.s32.totalorder %s20_s17, 6   ;;  %s1869_s13 = smov %s1354_s14 }
 0x1bd   : > { %s1870_s14 = smov %s1487_s29  ;;  %s1871_s15 = smov %s1362_s16 }
 0x1be   : > { %s1872_s16 = smov %s1874_s10  ;;  %19 = sbr.rel (!%p17_p7) target bundleno = 9 (0x9), region = 94 }
 0x1c3   :  { %909 = vsyncpa [#allocation4], 1 }
 0x1c4   :  { %911 = vsyncpa [#allocation4 + $0x1], 1 }
 0x1c5   :  { %912 = vsyncpa [#allocation7], 1 }
 0x1c6   :  { %913 = vsyncpa [#allocation5], 1 }
 0x1c7   :  { %915 = vsyncpa [#allocation5 + $0x1], 1 }

</bundles_post_ra>
